<compile_context>
chip_gen: v7x
topology: tpu7x:2x2x1
jax: 0.10.0
libtpu: 0.0.40
codegen_flags: <defaults>
</compile_context>

<pallas_src>
import functools

import jax
import jax.numpy as jnp
from jax.experimental import pallas as pl
from jax.experimental.pallas import tpu as pltpu


def mlp_kernel(x_ref, w1_ref, b1_ref, w2_ref, b2_ref, o_ref):
    """Fused Linear -> ReLU -> Linear -> Softmax on one batch tile (all operands in VMEM)."""
    # line1: x @ W1 + b1 (bf16 operands, f32 accumulation on the MXU)
    h = jnp.dot(x_ref[...], w1_ref[...], preferred_element_type=jnp.float32) + b1_ref[...]
    # relu (f32 on the VPU)
    h = jnp.maximum(h, 0.0)
    # line2: h @ W2 + b2 (activations fed back to the MXU as bf16, f32 accumulation)
    logits = (
        jnp.dot(h.astype(jnp.bfloat16), w2_ref[...], preferred_element_type=jnp.float32)
        + b2_ref[...]
    )
    # softmax over the class dim (nn.Softmax() on 2D input resolves to dim=1)
    m = jnp.max(logits, axis=-1, keepdims=True)
    e = jnp.exp(logits - m)
    denom = jnp.sum(e, axis=-1, keepdims=True)
    probs = e / denom  # exact divide: rows sum to 1 to f32 precision
    o_ref[...] = probs.astype(o_ref.dtype)


def _round_up(n, m):
    return ((n + m - 1) // m) * m


def _choose_batch_tile(batch, block_b):
    """Prefer an even, 2-step grid (one batch tile per v7x TensorCore); otherwise 1 step.
    The tile is capped at block_b rows (VMEM bound only matters for very large batches)."""
    b8 = _round_up(batch, 8)  # f32/bf16 sublane granularity
    half = b8 // 2
    if 8 <= half <= block_b and half % 8 == 0:
        return half
    return min(block_b, b8)


@functools.partial(jax.jit, static_argnames=("block_b",))
def neural_net_forward(x, w1, b1, w2, b2, *, block_b=1024):
    B, F = x.shape
    H = w1.shape[1]
    C = w2.shape[1]

    # bf16 MXU operands; biases / accumulation / activations stay f32.
    x_mxu = x.astype(jnp.bfloat16)
    w1_mxu = w1.astype(jnp.bfloat16)
    w2_mxu = w2.astype(jnp.bfloat16)
    b1 = b1.astype(jnp.float32)
    b2 = b2.astype(jnp.float32)

    TB = _choose_batch_tile(B, block_b)
    B_pad = _round_up(B, TB)
    if B_pad != B:
        # Ragged tail only (at most TB-1 rows); the padded rows are sliced off below.
        x_mxu = jnp.pad(x_mxu, ((0, B_pad - B), (0, 0)))
    grid = (B_pad // TB,)

    out = pl.pallas_call(
        mlp_kernel,
        out_shape=jax.ShapeDtypeStruct((B_pad, C), jnp.float32),
        grid_spec=pltpu.PrefetchScalarGridSpec(
            num_scalar_prefetch=0,
            grid=grid,
            in_specs=[
                pl.BlockSpec((TB, F), lambda i: (i, 0)),  # batch tile of x
                pl.BlockSpec((F, H), lambda i: (0, 0)),   # W1: constant index -> VMEM-resident
                pl.BlockSpec((1, H), lambda i: (0, 0)),   # b1
                pl.BlockSpec((H, C), lambda i: (0, 0)),   # W2
                pl.BlockSpec((1, C), lambda i: (0, 0)),   # b2
            ],
            # Narrow (TB, C) output block: C equals the full class dim (legal BlockSpec);
            # the HBM writeback is a contiguous TB*C*4-byte slab instead of a 128-padded tile.
            out_specs=pl.BlockSpec((TB, C), lambda i: (i, 0)),
        ),
        compiler_params=pltpu.CompilerParams(
            dimension_semantics=("parallel",),  # batch axis shards across v7x's two TCs
        ),
        cost_estimate=pl.CostEstimate(
            flops=2 * B_pad * (F * H + H * C),
            transcendentals=B_pad * C,
            bytes_accessed=(
                2 * (B_pad * F + F * H + H * C)  # bf16 reads: x, W1, W2
                + 4 * (H + C)                    # f32 reads: b1, b2
                + 4 * B_pad * C                  # f32 write: probs
            ),
        ),
    )(x_mxu, w1_mxu, b1, w2_mxu, b2)

    return out[:B] if B_pad != B else out


def init_params(key, input_size, hidden_size, num_classes):
    # PyTorch nn.Linear default init: U(-1/sqrt(fan_in), 1/sqrt(fan_in)).
    k1, k2, k3, k4 = jax.random.split(key, 4)
    bound1 = 1.0 / (input_size ** 0.5)
    bound2 = 1.0 / (hidden_size ** 0.5)
    w1 = jax.random.uniform(k1, (input_size, hidden_size), jnp.float32, -bound1, bound1)
    b1 = jax.random.uniform(k2, (1, hidden_size), jnp.float32, -bound1, bound1)
    w2 = jax.random.uniform(k3, (hidden_size, num_classes), jnp.float32, -bound2, bound2)
    b2 = jax.random.uniform(k4, (1, num_classes), jnp.float32, -bound2, bound2)
    return w1, b1, w2, b2


if __name__ == "__main__":
    input_size, hidden_size, num_classes = 16, 32, 10
    batch = 256  # -> TB=128, grid=(2,): one batch tile per TensorCore on v7x

    key = jax.random.PRNGKey(0)
    kx, kp = jax.random.split(key)
    x = jax.random.normal(kx, (batch, input_size), jnp.float32)
    w1, b1, w2, b2 = init_params(kp, input_size, hidden_size, num_classes)

    out = jax.block_until_ready(neural_net_forward(x, w1, b1, w2, b2))
    assert out.shape == (batch, num_classes)

    # Reference using the same bf16 MXU casts / f32 accumulation as the kernel.
    xb, w1b, w2b = (a.astype(jnp.bfloat16) for a in (x, w1, w2))
    h_ref = jnp.maximum(jnp.dot(xb, w1b, preferred_element_type=jnp.float32) + b1, 0.0)
    logits_ref = (
        jnp.dot(h_ref.astype(jnp.bfloat16), w2b, preferred_element_type=jnp.float32) + b2
    )
    ref = jax.nn.softmax(logits_ref, axis=-1)

    # Pure-f32 module reference (looser tolerance: bf16 MXU inputs vs f32).
    ref_f32 = jax.nn.softmax(jnp.maximum(x @ w1 + b1, 0.0) @ w2 + b2, axis=-1)

    assert jnp.allclose(jnp.sum(out, axis=-1), 1.0, atol=1e-3), "softmax rows must sum to 1"
    assert jnp.allclose(out, ref, atol=2e-3), "mismatch vs bf16-matched reference"
    assert jnp.allclose(out, ref_f32, atol=3e-2), "mismatch vs f32 module reference"

    print("KERNEL_OK")
</pallas_src>

<mosaic_0001>
module attributes {stable_mosaic.version = 11 : i64} {
  func.func @mlp_kernel(%arg0: i32, %arg1: memref<128x16xbf16, #tpu.memory_space<vmem>>, %arg2: memref<16x32xbf16, #tpu.memory_space<vmem>>, %arg3: memref<1x32xf32, #tpu.memory_space<vmem>>, %arg4: memref<32x10xbf16, #tpu.memory_space<vmem>>, %arg5: memref<1x10xf32, #tpu.memory_space<vmem>>, %arg6: memref<128x10xf32, #tpu.memory_space<vmem>>) attributes {dimension_semantics = [#tpu.dimension_semantics<parallel>], iteration_bounds = array<i64: 2>, scalar_prefetch = 0 : i64, scratch_operands = 0 : i64, tpu.core_type = #tpu.core_type<tc>, window_params = [{transform_indices = @transform_0, window_bounds = array<i64: 128, 16>}, {pipeline_mode = #tpu.pipeline_mode<synchronous>, transform_indices = @transform_1, window_bounds = array<i64: 16, 32>}, {pipeline_mode = #tpu.pipeline_mode<synchronous>, transform_indices = @transform_2, window_bounds = array<i64: 1, 32>}, {pipeline_mode = #tpu.pipeline_mode<synchronous>, transform_indices = @transform_3, window_bounds = array<i64: 32, 10>}, {pipeline_mode = #tpu.pipeline_mode<synchronous>, transform_indices = @transform_4, window_bounds = array<i64: 1, 10>}, {transform_indices = @transform_5, window_bounds = array<i64: 128, 10>}]} {
    %c0 = arith.constant 0 : index
    %c0_0 = arith.constant 0 : index
    %0 = vector.load %arg1[%c0, %c0_0] : memref<128x16xbf16, #tpu.memory_space<vmem>>, vector<128x16xbf16>
    %c0_1 = arith.constant 0 : index
    %c0_2 = arith.constant 0 : index
    %1 = vector.load %arg2[%c0_1, %c0_2] : memref<16x32xbf16, #tpu.memory_space<vmem>>, vector<16x32xbf16>
    %cst = arith.constant dense<0.000000e+00> : vector<128x32xf32>
    %2 = tpu.matmul %0, %1, %cst {dimension_numbers = #tpu.dot_dimension_numbers<[1], [0], [0], [1], [0, 0, 1, 1], [], []>} : vector<128x16xbf16>, vector<16x32xbf16>, vector<128x32xf32> -> vector<128x32xf32>
    %c0_3 = arith.constant 0 : index
    %c0_4 = arith.constant 0 : index
    %3 = vector.load %arg3[%c0_3, %c0_4] : memref<1x32xf32, #tpu.memory_space<vmem>>, vector<1x32xf32>
    %4 = vector.broadcast %3 : vector<1x32xf32> to vector<128x32xf32>
    %5 = arith.addf %2, %4 : vector<128x32xf32>
    %cst_5 = arith.constant 0.000000e+00 : f32
    %6 = vector.broadcast %cst_5 : f32 to vector<128x32xf32>
    %7 = arith.maximumf %5, %6 : vector<128x32xf32>
    %8 = arith.truncf %7 : vector<128x32xf32> to vector<128x32xbf16>
    %c0_6 = arith.constant 0 : index
    %c0_7 = arith.constant 0 : index
    %9 = vector.load %arg4[%c0_6, %c0_7] : memref<32x10xbf16, #tpu.memory_space<vmem>>, vector<32x10xbf16>
    %cst_8 = arith.constant dense<0.000000e+00> : vector<128x10xf32>
    %10 = tpu.matmul %8, %9, %cst_8 {dimension_numbers = #tpu.dot_dimension_numbers<[1], [0], [0], [1], [0, 0, 1, 1], [], []>} : vector<128x32xbf16>, vector<32x10xbf16>, vector<128x10xf32> -> vector<128x10xf32>
    %c0_9 = arith.constant 0 : index
    %c0_10 = arith.constant 0 : index
    %11 = vector.load %arg5[%c0_9, %c0_10] : memref<1x10xf32, #tpu.memory_space<vmem>>, vector<1x10xf32>
    %12 = vector.broadcast %11 : vector<1x10xf32> to vector<128x10xf32>
    %13 = arith.addf %10, %12 : vector<128x10xf32>
    %cst_11 = arith.constant dense<0xFF800000> : vector<128xf32>
    %14 = vector.multi_reduction <maximumf>, %13, %cst_11 [1] : vector<128x10xf32> to vector<128xf32>
    %15 = vector.shape_cast %14 : vector<128xf32> to vector<128x1xf32>
    %16 = vector.broadcast %15 : vector<128x1xf32> to vector<128x10xf32>
    %17 = arith.subf %13, %16 : vector<128x10xf32>
    %18 = math.exp %17 : vector<128x10xf32>
    %cst_12 = arith.constant dense<0.000000e+00> : vector<128xf32>
    %19 = vector.multi_reduction <add>, %18, %cst_12 [1] : vector<128x10xf32> to vector<128xf32>
    %20 = vector.shape_cast %19 : vector<128xf32> to vector<128x1xf32>
    %21 = vector.broadcast %20 : vector<128x1xf32> to vector<128x10xf32>
    %22 = arith.divf %18, %21 : vector<128x10xf32>
    %c0_13 = arith.constant 0 : index
    %c0_14 = arith.constant 0 : index
    %23 = vector.load %arg6[%c0_13, %c0_14] : memref<128x10xf32, #tpu.memory_space<vmem>>, vector<128x10xf32>
    tpu.vector_store %arg6[%c0_13, %c0_14], %22 {strides = array<i32>} : memref<128x10xf32, #tpu.memory_space<vmem>>, vector<128x10xf32>,
    return
  }
  func.func @transform_0(%arg0: i32) -> (i32, i32) {
    %c0_i32 = arith.constant 0 : i32
    %c0_i32_0 = arith.constant 0 : i32
    return %arg0, %c0_i32 : i32, i32
  }
  func.func @transform_1(%arg0: i32) -> (i32, i32) {
    %c0_i32 = arith.constant 0 : i32
    %c0_i32_0 = arith.constant 0 : i32
    %c0_i32_1 = arith.constant 0 : i32
    return %c0_i32, %c0_i32_0 : i32, i32
  }
  func.func @transform_2(%arg0: i32) -> (i32, i32) {
    %c0_i32 = arith.constant 0 : i32
    %c0_i32_0 = arith.constant 0 : i32
    %c0_i32_1 = arith.constant 0 : i32
    return %c0_i32, %c0_i32_0 : i32, i32
  }
  func.func @transform_3(%arg0: i32) -> (i32, i32) {
    %c0_i32 = arith.constant 0 : i32
    %c0_i32_0 = arith.constant 0 : i32
    %c0_i32_1 = arith.constant 0 : i32
    return %c0_i32, %c0_i32_0 : i32, i32
  }
  func.func @transform_4(%arg0: i32) -> (i32, i32) {
    %c0_i32 = arith.constant 0 : i32
    %c0_i32_0 = arith.constant 0 : i32
    %c0_i32_1 = arith.constant 0 : i32
    return %c0_i32, %c0_i32_0 : i32, i32
  }
  func.func @transform_5(%arg0: i32) -> (i32, i32) {
    %c0_i32 = arith.constant 0 : i32
    %c0_i32_0 = arith.constant 0 : i32
    return %arg0, %c0_i32 : i32, i32
  }
}

</mosaic_0001>

<bundles_post_ra>
// kernel: neural_net_forward.1
= control target key start
LH: loop header
LB: loop body
LE: loop exit
PB: predicated region body
PF: predicated region fallthrough
CT: control target
= control target key end

     0   :  { %s1058_s18 = smov 0   ;;  %s1304_s0 = inlined_call_operand.vmem [shape: bf16[256,16], index: 0, kind: input, shape index: {}]   ;;  %s1305_s1 = inlined_call_operand.vmem [shape: bf16[16,32], index: 1, kind: input, shape index: {}]   ;;  %s1306_s2 = inlined_call_operand.vmem [shape: f32[1,32], index: 2, kind: input, shape index: {}]   ;;  %s1307_s3 = inlined_call_operand.vmem [shape: bf16[32,10], index: 3, kind: input, shape index: {}]   ;;  %s1308_s4 = inlined_call_operand.vmem [shape: f32[1,10], index: 4, kind: input, shape index: {}]   ;;  %s1309_s5 = inlined_call_operand.vmem [shape: f32[256,10], index: 5, kind: output, shape index: {}]  }
   0x1 LB: > { %s840_s19 = sadd.s32 4294967295, %s1026_s18   ;;  %p844_p0 = scmp.ge.s32.totalorder %s1026_s18, 1  ;;  %s1026_s18 = sphi %s1058_s18, %s15_s18  }
   0x2   : > { %p188_p1 = scmp.lt.s32.totalorder %s1026_s18, 3 }
   0x4   : > { %p189_p2 = pnand %p844_p0, %p188_p1 }
   0x5   : > { %v945_v0 = vld [vmem:[%s1305_s1] sm:$0xff] (!%p189_p2)   ;;  %s845_s22 = sshll.u32 (!%p189_p2), %s840_s19, 4  ;;  %vm300_vm0 = vcmask (!%p189_p2), 130048   ;;  %v955_v10 = vld [vmem:[%s1307_s3 + $0x8] sm:$0xff] (!%p189_p2)   ;;  %vm469_vm1 = vcmask (!%p189_p2), 261120   ;;  %vm591_vm2 = vcmask (!%p189_p2), 80896  }
   0x6   : > { %192 = sbr.rel (%p189_p2) target bundleno = 801 (0x321), region = 40  ;;  %p217_p3 = scmp.lt.s32.totalorder (!%p189_p2), %s845_s22, 31  ;;  %899 = vmatprep.subr.bf16.mxu0 (!%p189_p2), %v945_v0  ;;  %v954_v9 = vld [vmem:[%s1307_s3] sm:$0xff] (!%p189_p2)  }
   0x7   : > { %900 = vmatpush3.bf16.msra.mxu0 (!%p189_p2), %v945_v0  ;;  %917 = vmatprep.subr.bf16.mxu1 (!%p189_p2), %v954_v9  ;;  %v849_v11 = vld [vmem:[%s1306_s2] ss:$0 sm:$0xff] (!%p189_p2) }
   0x8   : > { %918 = vmatpush3.bf16.msra.mxu1 (!%p189_p2), %v954_v9 }
   0x9   : > { %919 = vmatprep.subr.bf16.mxu1 (!%p189_p2), %v955_v10 }
   0xc   : > { %920 = vmatpush3.bf16.msra.mxu1 (!%p189_p2), %v955_v10 }
   0xd   : > { %s1311_s22 = smov (!%p217_p3, %s845_s22), 31 }
   0xe   : > { %s846_s23 = sshll.u32 %s1311_s22, 2  ;;  %s848_s10 = sshll.u32 %s1311_s22, 3 }
   0xf   : > { %s220_s26 = scalar_lea.vmem %s1304_s0, %s846_s23  ;;  %s1251_s13 = scalar_lea.vmem %s1309_s5, %s848_s10 }
  0x10   : > { %v946_v1 = vld [vmem:[%s220_s26] sm:$0xff]   ;;  %v947_v2 = vld [vmem:[%s220_s26 + $0x8] sm:$0xff]   ;;  %v948_v3 = vld [vmem:[%s220_s26 + $0x10] sm:$0xff]  }
  0x11   : > { %901 = vmatprep.mubr.msk.bf16.mxu0 %vm300_vm0, %v946_v1  ;;  %v949_v4 = vld [vmem:[%s220_s26 + $0x18] sm:$0xff]   ;;  %v950_v5 = vld [vmem:[%s220_s26 + $0x20] sm:$0xff]   ;;  %v951_v6 = vld [vmem:[%s220_s26 + $0x28] sm:$0xff]  }
  0x12   : > { %902 = vmatmul.mubr.msk.bf16.vlgmr.msra.gmra.mrb[0].mxu0 %vm300_vm0, %v947_v2  ;;  %v952_v7 = vld [vmem:[%s220_s26 + $0x30] sm:$0xff]   ;;  %v953_v8 = vld [vmem:[%s220_s26 + $0x38] sm:$0xff]  }
  0x13   : > { %905 = vmatprep.mubr.msk.bf16.mxu0 %vm300_vm0, %v948_v3 }
  0x1a   : > { %906 = vmatmul.mubr.msk.bf16.gmra.mrb[4].mxu0 %vm300_vm0, %v949_v4  ;;  %v867_v4 = vld [vmem:[%s1308_s4] ss:$0 sm:$0xff] }
  0x1b   : > { %909 = vmatprep.mubr.msk.bf16.mxu0 %vm300_vm0, %v950_v5 }
  0x22   : > { %910 = vmatmul.mubr.msk.bf16.gmra.mrb[8].mxu0 %vm300_vm0, %v951_v6 }
  0x23   : > { %913 = vmatprep.mubr.msk.bf16.mxu0 %vm300_vm0, %v952_v7 }
  0x2a   : > { %914 = vmatmul.mubr.msk.bf16.gmra.mrb[12].mxu0 %vm300_vm0, %v953_v8 }
  0xe5   : > { %v903_v12 = vpop.f32.mrb[0].mxu0 }
  0xe6   : > { %v368_v13 = vadd.f32 %v903_v12, %v849_v11  ;;  %v359_v14 = vpop.f32.mrb[1].mxu0 }
  0xe7   : > { %v360_v15 = vadd.f32 %v849_v11, %v359_v14  ;;  %v904_v16 = vpop.f32.mrb[2].mxu0 }
  0xe8   : > { %v371_v17 = vadd.f32 %v904_v16, %v849_v11  ;;  %v362_v18 = vpop.f32.mrb[3].mxu0  ;;  %v424_v20 = vmax.f32 %v368_v13, 0.0 }
  0xe9   : > { %v363_v19 = vadd.f32 %v849_v11, %v362_v18  ;;  %v422_v22 = vmax.f32 %v360_v15, 0.0 }
  0xea   : > { %v425_v21 = vmax.f32 %v371_v17, 0.0 }
  0xeb   : > { %v423_v23 = vmax.f32 %v363_v19, 0.0 }
  0xec   : > { %v439_v24 = vpack.c.bf16 %v425_v21, %v424_v20 }
  0xed   : > { %v907_v25 = vpop.f32.mrb[4].mxu0  ;;  %v438_v26 = vpack.c.bf16 %v423_v23, %v422_v22 }
  0xee   : > { %v384_v27 = vadd.f32 %v907_v25, %v849_v11  ;;  %v375_v28 = vpop.f32.mrb[5].mxu0 }
  0xef   : > { %v376_v29 = vadd.f32 %v849_v11, %v375_v28  ;;  %v908_v30 = vpop.f32.mrb[6].mxu0  ;;  %921 = vmatprep.mubr.msk.bf16.mxu1 %vm469_vm1, %v438_v26 }
  0xf0   : > { %v428_v31 = vmax.f32 %v384_v27, 0.0  ;;  %v387_v32 = vadd.f32 %v908_v30, %v849_v11  ;;  %v378_v33 = vpop.f32.mrb[7].mxu0  ;;  %922 = vmatmul.mubr.msk.bf16.vlgmr.msra.gmra.mrb[0].mxu1 %vm469_vm1, %v439_v24 }
  0xf1   : > { %v379_v34 = vadd.f32 %v849_v11, %v378_v33  ;;  %v426_v36 = vmax.f32 %v376_v29, 0.0 }
  0xf2   : > { %v429_v35 = vmax.f32 %v387_v32, 0.0 }
  0xf3   : > { %v427_v37 = vmax.f32 %v379_v34, 0.0 }
  0xf4   : > { %v441_v38 = vpack.c.bf16 %v429_v35, %v428_v31 }
  0xf5   : > { %v440_v39 = vpack.c.bf16 %v427_v37, %v426_v36  ;;  %v911_v40 = vpop.f32.mrb[8].mxu0 }
  0xf6   : > { %v400_v41 = vadd.f32 %v911_v40, %v849_v11  ;;  %v391_v42 = vpop.f32.mrb[9].mxu0 }
  0xf7   : > { %v392_v43 = vadd.f32 %v849_v11, %v391_v42  ;;  %v912_v44 = vpop.f32.mrb[10].mxu0  ;;  %925 = vmatprep.mubr.msk.bf16.mxu1 %vm469_vm1, %v440_v39 }
  0xf8   : > { %v432_v45 = vmax.f32 %v400_v41, 0.0  ;;  %v403_v46 = vadd.f32 %v912_v44, %v849_v11  ;;  %v394_v47 = vpop.f32.mrb[11].mxu0  ;;  %926 = vmatmul.mubr.msk.bf16.gmra.mrb[4].mxu1 %vm469_vm1, %v441_v38 }
  0xf9   : > { %v395_v48 = vadd.f32 %v849_v11, %v394_v47  ;;  %v430_v50 = vmax.f32 %v392_v43, 0.0 }
  0xfa   : > { %v433_v49 = vmax.f32 %v403_v46, 0.0 }
  0xfb   : > { %v431_v51 = vmax.f32 %v395_v48, 0.0 }
  0xfc   : > { %v443_v52 = vpack.c.bf16 %v433_v49, %v432_v45 }
  0xfd   : > { %v442_v53 = vpack.c.bf16 %v431_v51, %v430_v50  ;;  %v915_v54 = vpop.f32.mrb[12].mxu0 }
  0xfe   : > { %v416_v55 = vadd.f32 %v915_v54, %v849_v11  ;;  %v407_v56 = vpop.f32.mrb[13].mxu0 }
  0xff   : > { %v408_v57 = vadd.f32 %v849_v11, %v407_v56  ;;  %v916_v58 = vpop.f32.mrb[14].mxu0  ;;  %929 = vmatprep.mubr.msk.bf16.mxu1 %vm469_vm1, %v442_v53 }
 0x100   : > { %v436_v59 = vmax.f32 %v416_v55, 0.0  ;;  %v419_v60 = vadd.f32 %v916_v58, %v849_v11  ;;  %v410_v61 = vpop.f32.mrb[15].mxu0  ;;  %930 = vmatmul.mubr.msk.bf16.gmra.mrb[8].mxu1 %vm469_vm1, %v443_v52 }
 0x101   : > { %v411_v62 = vadd.f32 %v849_v11, %v410_v61  ;;  %v434_v0 = vmax.f32 %v408_v57, 0.0 }
 0x102   : > { %v437_v63 = vmax.f32 %v419_v60, 0.0 }
 0x103   : > { %v435_v1 = vmax.f32 %v411_v62, 0.0 }
 0x104   : > { %v445_v2 = vpack.c.bf16 %v437_v63, %v436_v59 }
 0x105   : > { %v444_v3 = vpack.c.bf16 %v435_v1, %v434_v0 }
 0x107   : > { %933 = vmatprep.mubr.msk.bf16.mxu1 %vm469_vm1, %v444_v3 }
 0x108   : > { %934 = vmatmul.mubr.msk.bf16.gmra.mrb[12].mxu1 %vm469_vm1, %v445_v2 }
 0x1c3   : > { %v923_v5 = vpop.f32.mrb[0].mxu1 }
 0x1c4   : > { %v1103_v6 = vadd.f32 %v923_v5, %v867_v4  ;;  %v528_v7 = vpop.f32.mrb[1].mxu1 }
 0x1c5   : > { %v1105_v8 = vadd.f32 %v867_v4, %v528_v7  ;;  %v924_v9 = vpop.f32.mrb[2].mxu1 }
 0x1c6   : > { %v1107_v10 = vadd.f32 %v924_v9, %v867_v4  ;;  %v531_v11 = vpop.f32.mrb[3].mxu1  ;;  %v598_v12 = vsel %vm591_vm2, %v1103_v6, -inf }
 0x1c7   : > { %v1111_v13 = vadd.f32 %v867_v4, %v531_v11  ;;  %599 = vmax.xlane.f32.xlu1 %v598_v12  ;;  %v592_v14 = vsel %vm591_vm2, %v1105_v8, -inf }
 0x1c8   : > { %593 = vmax.xlane.f32.xlu0 %v592_v14  ;;  %v601_v15 = vsel %vm591_vm2, %v1107_v10, -inf }
 0x1c9   : > { %v595_v17 = vsel %vm591_vm2, %v1111_v13, -inf }
 0x1cb   : > { %602 = vmax.xlane.f32.xlu1 %v601_v15  ;;  %v927_v16 = vpop.f32.mrb[4].mxu1 }
 0x1cc   : > { %v1119_v18 = vadd.f32 %v927_v16, %v867_v4  ;;  %v544_v19 = vpop.f32.mrb[5].mxu1  ;;  %596 = vmax.xlane.f32.xlu0 %v595_v17 }
 0x1cd   : > { %v928_v20 = vpop.f32.mrb[6].mxu1  ;;  %v1125_v24 = vadd.f32 %v867_v4, %v544_v19 }
 0x1ce   : > { %v1121_v21 = vadd.f32 %v928_v20, %v867_v4  ;;  %v547_v22 = vpop.f32.mrb[7].mxu1  ;;  %v610_v23 = vsel %vm591_vm2, %v1119_v18, -inf }
 0x1cf   : > { %v1127_v25 = vadd.f32 %v867_v4, %v547_v22  ;;  %v604_v28 = vsel %vm591_vm2, %v1125_v24, -inf }
 0x1d0   : > { %611 = vmax.xlane.f32.xlu0 %v610_v23  ;;  %v613_v26 = vsel %vm591_vm2, %v1121_v21, -inf }
 0x1d1   : > { %614 = vmax.xlane.f32.xlu1 %v613_v26  ;;  %v607_v31 = vsel %vm591_vm2, %v1127_v25, -inf }
 0x1d3   : > { %v931_v27 = vpop.f32.mrb[8].mxu1 }
 0x1d4   : > { %v1133_v29 = vadd.f32 %v931_v27, %v867_v4  ;;  %v560_v30 = vpop.f32.mrb[9].mxu1  ;;  %605 = vmax.xlane.f32.xlu0 %v604_v28 }
 0x1d5   : > { %v932_v32 = vpop.f32.mrb[10].mxu1  ;;  %608 = vmax.xlane.f32.xlu1 %v607_v31  ;;  %v1141_v36 = vadd.f32 %v867_v4, %v560_v30 }
 0x1d6   : > { %v1137_v33 = vadd.f32 %v932_v32, %v867_v4  ;;  %v563_v34 = vpop.f32.mrb[11].mxu1  ;;  %v622_v35 = vsel %vm591_vm2, %v1133_v29, -inf }
 0x1d7   : > { %v1143_v37 = vadd.f32 %v867_v4, %v563_v34  ;;  %v616_v40 = vsel %vm591_vm2, %v1141_v36, -inf }
 0x1d8   : > { %623 = vmax.xlane.f32.xlu0 %v622_v35  ;;  %v625_v38 = vsel %vm591_vm2, %v1137_v33, -inf }
 0x1d9   : > { %626 = vmax.xlane.f32.xlu1 %v625_v38  ;;  %v619_v42 = vsel %vm591_vm2, %v1143_v37, -inf }
 0x1db   : > { %v935_v39 = vpop.f32.mrb[12].mxu1 }
 0x1dc   : > { %v576_v41 = vpop.f32.mrb[13].mxu1  ;;  %617 = vmax.xlane.f32.xlu0 %v616_v40  ;;  %v1153_v46 = vadd.f32 %v935_v39, %v867_v4 }
 0x1dd   : > { %v1151_v43 = vadd.f32 %v867_v4, %v576_v41  ;;  %v936_v44 = vpop.f32.mrb[14].mxu1  ;;  %620 = vmax.xlane.f32.xlu1 %v619_v42 }
 0x1de   : > { %v579_v45 = vpop.f32.mrb[15].mxu1  ;;  %v1159_v49 = vadd.f32 %v936_v44, %v867_v4  ;;  %v634_v51 = vsel %vm591_vm2, %v1153_v46, -inf }
 0x1df   : > { %v1155_v47 = vadd.f32 %v867_v4, %v579_v45  ;;  %v628_v48 = vsel %vm591_vm2, %v1151_v43, -inf }
 0x1e0   : > { %629 = vmax.xlane.f32.xlu0 %v628_v48  ;;  %v637_v52 = vsel %vm591_vm2, %v1159_v49, -inf }
 0x1e1   : > { %v631_v50 = vsel %vm591_vm2, %v1155_v47, -inf }
 0x1e2   : > { %632 = vmax.xlane.f32.xlu1 %v631_v50 }
 0x1e4   : > { %635 = vmax.xlane.f32.xlu0 %v634_v51 }
 0x1e6   : > { %638 = vmax.xlane.f32.xlu1 %v637_v52 }
 0x254   : > { %v600_v53 = vpop.xlane.xlu1 %599 }
 0x255   : > { %v642_v54 = vsub.f32 %v1103_v6, %v600_v53  ;;  %v594_v55 = vpop.xlane.xlu0 %593 }
 0x256   : > { %v640_v56 = vsub.f32 %v1105_v8, %v594_v55 }
 0x257   : > { %v660_v57 = vmul.f32 1.442695, %v642_v54 }
 0x258   : > { %v656_v58 = vmul.f32 1.442695, %v640_v56  ;;  %v603_v59 = vpop.xlane.xlu1 %602 }
 0x259   : > { %956 = vpow2.f32 %v660_v57  ;;  %v643_v60 = vsub.f32 %v1107_v10, %v603_v59  ;;  %v597_v61 = vpop.xlane.xlu0 %596 }
 0x25a   : > { %v641_v62 = vsub.f32 %v1111_v13, %v597_v61  ;;  %958 = vpow2.f32 %v656_v58 }
 0x25b   : > { %v662_v63 = vmul.f32 1.442695, %v643_v60 }
 0x25c   : > { %v658_v0 = vmul.f32 1.442695, %v641_v62 }
 0x25d   : > { %960 = vpow2.f32 %v662_v63  ;;  %v612_v1 = vpop.xlane.xlu0 %611 }
 0x25e   : > { %v646_v2 = vsub.f32 %v1119_v18, %v612_v1  ;;  %v615_v3 = vpop.xlane.xlu1 %614  ;;  %962 = vpow2.f32 %v658_v0 }
 0x25f   : > { %v647_v4 = vsub.f32 %v1121_v21, %v615_v3 }
 0x260   : > { %v668_v5 = vmul.f32 1.442695, %v646_v2 }
 0x261   : > { %v670_v6 = vmul.f32 1.442695, %v647_v4  ;;  %v606_v7 = vpop.xlane.xlu0 %605 }
 0x262   : > { %964 = vpow2.f32 %v668_v5  ;;  %v644_v8 = vsub.f32 %v1125_v24, %v606_v7  ;;  %v609_v9 = vpop.xlane.xlu1 %608 }
 0x263   : > { %v1174_v10 = vpop.eup %956  ;;  %966 = vpow2.f32 %v670_v6  ;;  %v645_v11 = vsub.f32 %v1127_v25, %v609_v9 }
 0x264   : > { %v664_v12 = vmul.f32 1.442695, %v644_v8  ;;  %v694_v13 = vsel %vm591_vm2, %v1174_v10, 0.0  ;;  %v1179_v14 = vpop.eup %958 }
 0x265   : > { %v666_v15 = vmul.f32 1.442695, %v645_v11  ;;  %695 = vadd.xlane.f32.xlu0 %v694_v13  ;;  %v624_v16 = vpop.xlane.xlu0 %623  ;;  %v688_v23 = vsel %vm591_vm2, %v1179_v14, 0.0 }
 0x266   : > { %968 = vpow2.f32 %v664_v12  ;;  %v650_v17 = vsub.f32 %v1133_v29, %v624_v16  ;;  %v627_v18 = vpop.xlane.xlu1 %626 }
 0x267   : > { %v1182_v19 = vpop.eup %960  ;;  %970 = vpow2.f32 %v666_v15  ;;  %v651_v20 = vsub.f32 %v1137_v33, %v627_v18 }
 0x268   : > { %v676_v21 = vmul.f32 1.442695, %v650_v17  ;;  %v697_v22 = vsel %vm591_vm2, %v1182_v19, 0.0  ;;  %v1189_v24 = vpop.eup %962 }
 0x269   : > { %v678_v25 = vmul.f32 1.442695, %v651_v20  ;;  %698 = vadd.xlane.f32.xlu1 %v697_v22  ;;  %689 = vadd.xlane.f32.xlu0 %v688_v23  ;;  %v618_v26 = vpop.xlane.xlu0 %617  ;;  %v691_v32 = vsel %vm591_vm2, %v1189_v24, 0.0 }
 0x26a   : > { %972 = vpow2.f32 %v676_v21  ;;  %v648_v27 = vsub.f32 %v1141_v36, %v618_v26  ;;  %v621_v28 = vpop.xlane.xlu1 %620 }
 0x26b   : > { %974 = vpow2.f32 %v678_v25  ;;  %v649_v29 = vsub.f32 %v1143_v37, %v621_v28 }
 0x26c   : > { %v1193_v30 = vpop.eup %964  ;;  %v672_v31 = vmul.f32 1.442695, %v648_v27 }
 0x26d   : > { %v1197_v33 = vpop.eup %966  ;;  %v674_v34 = vmul.f32 1.442695, %v649_v29  ;;  %692 = vadd.xlane.f32.xlu1 %v691_v32  ;;  %v630_v35 = vpop.xlane.xlu0 %629  ;;  %v706_v38 = vsel %vm591_vm2, %v1193_v30, 0.0 }
 0x26e   : > { %976 = vpow2.f32 %v672_v31  ;;  %v652_v36 = vsub.f32 %v1151_v43, %v630_v35  ;;  %707 = vadd.xlane.f32.xlu0 %v706_v38  ;;  %v709_v42 = vsel %vm591_vm2, %v1197_v33, 0.0 }
 0x26f   : > { %978 = vpow2.f32 %v674_v34  ;;  %v633_v37 = vpop.xlane.xlu1 %632 }
 0x270   : > { %v1202_v39 = vpop.eup %968  ;;  %v680_v40 = vmul.f32 1.442695, %v652_v36  ;;  %v653_v41 = vsub.f32 %v1155_v47, %v633_v37 }
 0x271   : > { %v1207_v44 = vpop.eup %970  ;;  %710 = vadd.xlane.f32.xlu1 %v709_v42  ;;  %v636_v45 = vpop.xlane.xlu0 %635  ;;  %v700_v48 = vsel %vm591_vm2, %v1202_v39, 0.0 }
 0x272   : > { %980 = vpow2.f32 %v680_v40  ;;  %v682_v43 = vmul.f32 1.442695, %v653_v41  ;;  %v654_v50 = vsub.f32 %v1153_v46, %v636_v45  ;;  %701 = vadd.xlane.f32.xlu0 %v700_v48  ;;  %v703_v54 = vsel %vm591_vm2, %v1207_v44, 0.0 }
 0x273   : > { %v639_v51 = vpop.xlane.xlu1 %638 }
 0x274   : > { %v1212_v52 = vpop.eup %972  ;;  %982 = vpow2.f32 %v682_v43  ;;  %v684_v47 = vmul.f32 1.442695, %v654_v50  ;;  %v655_v53 = vsub.f32 %v1159_v49, %v639_v51 }
 0x275   : > { %v1217_v55 = vpop.eup %974  ;;  %704 = vadd.xlane.f32.xlu1 %v703_v54  ;;  %v718_v56 = vsel %vm591_vm2, %v1212_v52, 0.0 }
 0x276   : > { %984 = vpow2.f32 %v684_v47  ;;  %v686_v57 = vmul.f32 1.442695, %v655_v53  ;;  %719 = vadd.xlane.f32.xlu0 %v718_v56  ;;  %v721_v58 = vsel %vm591_vm2, %v1217_v55, 0.0 }
 0x278   : > { %v1221_v46 = vpop.eup %976  ;;  %986 = vpow2.f32 %v686_v57 }
 0x279   : > { %v1225_v59 = vpop.eup %978  ;;  %722 = vadd.xlane.f32.xlu1 %v721_v58  ;;  %v712_v49 = vsel %vm591_vm2, %v1221_v46, 0.0 }
 0x27a   : > { %713 = vadd.xlane.f32.xlu0 %v712_v49  ;;  %v715_v61 = vsel %vm591_vm2, %v1225_v59, 0.0 }
 0x27c   : > { %v1229_v60 = vpop.eup %980 }
 0x27d   : > { %716 = vadd.xlane.f32.xlu1 %v715_v61  ;;  %v724_v62 = vsel %vm591_vm2, %v1229_v60, 0.0 }
 0x27e   : > { %v1235_v63 = vpop.eup %982  ;;  %725 = vadd.xlane.f32.xlu0 %v724_v62 }
 0x27f   : > { %v727_v0 = vsel %vm591_vm2, %v1235_v63, 0.0 }
 0x280   : > { %v1239_v1 = vpop.eup %984 }
 0x281   : > { %728 = vadd.xlane.f32.xlu1 %v727_v0  ;;  %v730_v2 = vsel %vm591_vm2, %v1239_v1, 0.0 }
 0x282   : > { %v1243_v3 = vpop.eup %986  ;;  %731 = vadd.xlane.f32.xlu0 %v730_v2 }
 0x283   : > { %v733_v4 = vsel %vm591_vm2, %v1243_v3, 0.0 }
 0x285   : > { %734 = vadd.xlane.f32.xlu1 %v733_v4 }
 0x2f2   : > { %v696_v5 = vpop.xlane.xlu0 %695 }
 0x2f3   : > { %988 = vrcp.f32 %v696_v5 }
 0x2f6   : > { %v699_v6 = vpop.xlane.xlu1 %698  ;;  %v690_v7 = vpop.xlane.xlu0 %689 }
 0x2f7   : > { %990 = vrcp.f32 %v699_v6 }
 0x2f8   : > { %992 = vrcp.f32 %v690_v7 }
 0x2fa   : > { %v693_v8 = vpop.xlane.xlu1 %692 }
 0x2fb   : > { %994 = vrcp.f32 %v693_v8  ;;  %v708_v9 = vpop.xlane.xlu0 %707 }
 0x2fc   : > { %996 = vrcp.f32 %v708_v9 }
 0x2fd   : > { %v989_v11 = vpop.eup %988 }
 0x2fe   : > { %v741_v12 = vmul.f32 %v989_v11, %v1174_v10  ;;  %v711_v13 = vpop.xlane.xlu1 %710 }
 0x2ff   : > { %998 = vrcp.f32 %v711_v13  ;;  %v702_v15 = vpop.xlane.xlu0 %701 }
 0x300   : > { %770 = vst.msk [vmem:[%s1251_s13 + $0x10] sm:$0xff] %vm591_vm2, %v741_v12  ;;  %1000 = vrcp.f32 %v702_v15 }
 0x301   : > { %v991_v16 = vpop.eup %990 }
 0x302   : > { %v993_v17 = vpop.eup %992  ;;  %v743_v18 = vmul.f32 %v991_v16, %v1182_v19  ;;  %v705_v20 = vpop.xlane.xlu1 %704 }
 0x303   : > { %v737_v21 = vmul.f32 %v993_v17, %v1179_v14  ;;  %1002 = vrcp.f32 %v705_v20  ;;  %v720_v22 = vpop.xlane.xlu0 %719 }
 0x304   : > { %771 = vst.msk [vmem:[%s1251_s13 + $0x18] sm:$0xff] %vm591_vm2, %v743_v18  ;;  %1004 = vrcp.f32 %v720_v22 }
 0x305   : > { %v995_v10 = vpop.eup %994  ;;  %768 = vst.msk [vmem:[%s1251_s13] sm:$0xff] %vm591_vm2, %v737_v21 }
 0x306   : > { %v997_v23 = vpop.eup %996  ;;  %v739_v25 = vmul.f32 %v995_v10, %v1189_v24  ;;  %v723_v26 = vpop.xlane.xlu1 %722 }
 0x307   : > { %v749_v27 = vmul.f32 %v997_v23, %v1193_v30  ;;  %1006 = vrcp.f32 %v723_v26  ;;  %v714_v19 = vpop.xlane.xlu0 %713 }
 0x308   : > { %769 = vst.msk [vmem:[%s1251_s13 + $0x8] sm:$0xff] %vm591_vm2, %v739_v25  ;;  %1008 = vrcp.f32 %v714_v19 }
 0x309   : > { %v999_v14 = vpop.eup %998  ;;  %774 = vst.msk [vmem:[%s1251_s13 + $0x30] sm:$0xff] %vm591_vm2, %v749_v27 }
 0x30a   : > { %v1001_v28 = vpop.eup %1000  ;;  %v751_v29 = vmul.f32 %v999_v14, %v1197_v33  ;;  %v717_v31 = vpop.xlane.xlu1 %716 }
 0x30b   : > { %v745_v32 = vmul.f32 %v1001_v28, %v1202_v39  ;;  %1010 = vrcp.f32 %v717_v31  ;;  %v726_v24 = vpop.xlane.xlu0 %725 }
 0x30c   : > { %775 = vst.msk [vmem:[%s1251_s13 + $0x38] sm:$0xff] %vm591_vm2, %v751_v29  ;;  %1012 = vrcp.f32 %v726_v24 }
 0x30d   : > { %v1003_v30 = vpop.eup %1002  ;;  %772 = vst.msk [vmem:[%s1251_s13 + $0x20] sm:$0xff] %vm591_vm2, %v745_v32 }
 0x30e   : > { %v1005_v34 = vpop.eup %1004  ;;  %v747_v35 = vmul.f32 %v1003_v30, %v1207_v44  ;;  %v729_v38 = vpop.xlane.xlu1 %728 }
 0x30f   : > { %v757_v33 = vmul.f32 %v1005_v34, %v1212_v52  ;;  %1014 = vrcp.f32 %v729_v38  ;;  %v732_v36 = vpop.xlane.xlu0 %731 }
 0x310   : > { %773 = vst.msk [vmem:[%s1251_s13 + $0x28] sm:$0xff] %vm591_vm2, %v747_v35  ;;  %1016 = vrcp.f32 %v732_v36 }
 0x311   : > { %v1007_v37 = vpop.eup %1006  ;;  %778 = vst.msk [vmem:[%s1251_s13 + $0x50] sm:$0xff] %vm591_vm2, %v757_v33 }
 0x312   : > { %v1009_v39 = vpop.eup %1008  ;;  %v759_v40 = vmul.f32 %v1007_v37, %v1217_v55  ;;  %v735_v41 = vpop.xlane.xlu1 %734 }
 0x313   : > { %v753_v42 = vmul.f32 %v1009_v39, %v1221_v46  ;;  %1018 = vrcp.f32 %v735_v41 }
 0x314   : > { %779 = vst.msk [vmem:[%s1251_s13 + $0x58] sm:$0xff] %vm591_vm2, %v759_v40 }
 0x315   : > { %v1011_v44 = vpop.eup %1010  ;;  %776 = vst.msk [vmem:[%s1251_s13 + $0x40] sm:$0xff] %vm591_vm2, %v753_v42 }
 0x316   : > { %v1013_v45 = vpop.eup %1012  ;;  %v755_v48 = vmul.f32 %v1011_v44, %v1225_v59 }
 0x317   : > { %v761_v43 = vmul.f32 %v1013_v45, %v1229_v60 }
 0x318   : > { %777 = vst.msk [vmem:[%s1251_s13 + $0x48] sm:$0xff] %vm591_vm2, %v755_v48 }
 0x319   : > { %v1015_v50 = vpop.eup %1014  ;;  %780 = vst.msk [vmem:[%s1251_s13 + $0x60] sm:$0xff] %vm591_vm2, %v761_v43 }
 0x31a   : > { %v1017_v51 = vpop.eup %1016  ;;  %v763_v52 = vmul.f32 %v1015_v50, %v1235_v63 }
 0x31b   : > { %v765_v47 = vmul.f32 %v1017_v51, %v1239_v1 }
 0x31c   : > { %781 = vst.msk [vmem:[%s1251_s13 + $0x68] sm:$0xff] %vm591_vm2, %v763_v52 }
 0x31d   : > { %v1019_v53 = vpop.eup %1018  ;;  %782 = vst.msk [vmem:[%s1251_s13 + $0x70] sm:$0xff] %vm591_vm2, %v765_v47 }
 0x31e   : > { %v767_v54 = vmul.f32 %v1019_v53, %v1243_v3 }
 0x320   : > { %783 = vst.msk [vmem:[%s1251_s13 + $0x78] sm:$0xff] %vm591_vm2, %v767_v54 }
 0x321 PF: > { %s15_s18 = sadd.s32 1, %s1026_s18  }
 0x322   : > { %p12_p4 = scmp.ge.s32.totalorder %s15_s18, 4  }
 0x324   :  { %14 = sbr.rel (!%p12_p4) target bundleno = 1 (0x1), region = 70 }

</bundles_post_ra>
